<compile_context>
chip_gen: v7x
topology: tpu7x:2x2x1
jax: 0.10.0
libtpu: 0.0.40
codegen_flags: <defaults>
</compile_context>

<pallas_src>
import functools

import jax
import jax.numpy as jnp
from jax.experimental import pallas as pl
from jax.experimental.pallas import tpu as pltpu

_NEG = -1.0e30  # sentinel bias for padded output lanes (exp underflows to 0)


def _policy_kernel(
    inv_temp_ref,                               # scalar prefetch (SMEM): 1/T
    x_ref, w0_ref, w1_ref, w2_ref, sp_ref,      # inputs
    out_ref,                                    # (TB, 2*OP) lane-dense slab
    *, ln_eps, H, OUT, OP,
):
    inv_temp = inv_temp_ref[0]
    x = x_ref[...]
    sp = sp_ref[...]  # (8, PW) packed small params (f32)
    b0, g0, be0 = sp[0:1, :H], sp[1:2, :H], sp[2:3, :H]
    b1, g1, be1 = sp[3:4, :H], sp[4:5, :H], sp[5:6, :H]
    b2 = sp[6:7, :OP]

    def hidden_layer(h, w_ref, b, g, be):
        # bf16 MXU inputs, f32 accumulation; LayerNorm + ReLU in f32.
        h = jnp.dot(h.astype(jnp.bfloat16), w_ref[...],
                    preferred_element_type=jnp.float32) + b
        mean = jnp.mean(h, axis=-1, keepdims=True)
        cent = h - mean
        var = jnp.mean(cent * cent, axis=-1, keepdims=True)
        h = cent * jax.lax.rsqrt(var + ln_eps) * g + be
        return jnp.maximum(h, 0.0)

    h = hidden_layer(x, w0_ref, b0, g0, be0)
    h = hidden_layer(h, w1_ref, b1, g1, be1)

    # Output projection -> logits (padded lanes get -1e30 from b2).
    logits = jnp.dot(h.astype(jnp.bfloat16), w2_ref[...],
                     preferred_element_type=jnp.float32) + b2

    # Temperature-scaled softmax (BasePolicy.get_action_probabilities).
    # Clamp so a tiny temperature cannot push the pad sentinel to -inf
    # (which would turn 0 * -inf into NaN in the entropy sum).
    z = jnp.maximum(logits * inv_temp, _NEG)
    z = z - jnp.max(z, axis=-1, keepdims=True)
    e = jnp.exp(z)                                   # exactly 0 on pad lanes
    denom = jnp.sum(e, axis=-1, keepdims=True)
    probs = e * pl.reciprocal(denom, approx=False)

    # Entropy (BasePolicy.compute_entropy) via log-sum-exp identity:
    #   -sum(p*log p) = log(denom) - sum(p * z)   (pad lanes: 0 * finite = 0)
    ent = jnp.log(denom) - jnp.sum(probs * z, axis=-1, keepdims=True)

    tb = logits.shape[0]
    lane = jax.lax.broadcasted_iota(jnp.int32, (tb, OP), 1)
    first = jnp.where(lane < OUT, logits, jnp.broadcast_to(ent, (tb, OP)))

    # Two 128-aligned, lane-dense, unmasked stores into the output slab.
    out_ref[:, 0:OP] = first            # logits in [:OUT], entropy in pad lanes
    out_ref[:, OP:2 * OP] = probs


def pack_params(params):
    """One-time packing (off the hot path): pad w2/b2 to a 128-multiple output
    width, store matmul weights in bf16, pack all small per-row vectors into a
    single (8, PW) f32 slab (one DMA instead of 7)."""
    IN, H = params["w0"].shape
    OUT = params["w2"].shape[1]
    # Ensure at least one pad lane so entropy has a home in the logits half.
    OP = pl.cdiv(max(OUT + 1, 128), 128) * 128
    PW = max(H, OP)

    w2p = jnp.zeros((H, OP), jnp.float32).at[:, :OUT].set(params["w2"])
    b2p = jnp.full((OP,), _NEG, jnp.float32).at[:OUT].set(
        params["b2"].reshape(-1))

    def row(v):
        v = v.reshape(-1).astype(jnp.float32)
        return jnp.zeros((PW,), jnp.float32).at[: v.shape[0]].set(v)

    sp = jnp.stack(
        [
            row(params["b0"]), row(params["g0"]), row(params["be0"]),
            row(params["b1"]), row(params["g1"]), row(params["be1"]),
            jnp.zeros((PW,), jnp.float32).at[:OP].set(b2p),
            jnp.zeros((PW,), jnp.float32),
        ],
        axis=0,
    )  # (8, PW)

    return {
        "w0": params["w0"].astype(jnp.bfloat16),
        "w1": params["w1"].astype(jnp.bfloat16),
        "w2p": w2p.astype(jnp.bfloat16),
        "sp": sp,
    }


def _choose_batch_tile(B):
    """Large MXU M-tile, but keep >= 2 grid steps when the batch allows it so
    v7x's second TensorCore gets work via 'parallel' dimension semantics."""
    base = 8        # f32 sublane multiple (x / output slab are f32)
    tb_max = 256    # VMEM cost of a (256, IN) f32 tile is trivial here
    bp = pl.cdiv(B, base) * base
    if bp >= 2 * tb_max:
        tb = tb_max
    elif bp > base:
        tb = pl.cdiv(pl.cdiv(bp, 2), base) * base
    else:
        tb = base
    bp = pl.cdiv(bp, tb) * tb
    return tb, bp


def policy_forward(x, packed, *, out_dim, temperature=1.0, ln_eps=1e-5):
    """Full policy hot path in one Pallas call.

    Returns (logits, probs, entropy) with shapes (B, out), (B, out), (B,)."""
    IN, H = packed["w0"].shape          # static shapes -> Python ints under jit
    OP = packed["w2p"].shape[1]
    PW = packed["sp"].shape[1]
    OUT = int(out_dim)
    B = x.shape[0]

    TB, Bp = _choose_batch_tile(B)
    xp = x if Bp == B else jnp.zeros((Bp, IN), x.dtype).at[:B].set(x)

    # SMEM scalar: temperature changes reuse the compiled kernel (no recompile).
    inv_temp = (1.0 / jnp.asarray(temperature, jnp.float32)).reshape(1)

    kernel = functools.partial(
        _policy_kernel, ln_eps=float(ln_eps), H=H, OUT=OUT, OP=OP)

    grid_spec = pltpu.PrefetchScalarGridSpec(
        num_scalar_prefetch=1,
        grid=(Bp // TB,),
        in_specs=[
            pl.BlockSpec((TB, IN), lambda i, s: (i, 0)),   # x: tiled over batch
            pl.BlockSpec((IN, H), lambda i, s: (0, 0)),    # w0: VMEM-resident
            pl.BlockSpec((H, H), lambda i, s: (0, 0)),     # w1: VMEM-resident
            pl.BlockSpec((H, OP), lambda i, s: (0, 0)),    # w2 (padded, bf16)
            pl.BlockSpec((8, PW), lambda i, s: (0, 0)),    # packed small params
        ],
        out_specs=pl.BlockSpec((TB, 2 * OP), lambda i, s: (i, 0)),
    )

    # All static Python ints now (previous bug: these were tracers).
    flops = int(2 * Bp * (IN * H + H * H + H * OP) + 12 * Bp * H)
    transcendentals = int(Bp * (OP + 8))
    bytes_accessed = int(4 * Bp * IN + 2 * (IN * H + H * H + H * OP)
                         + 4 * 8 * PW + 4 * Bp * 2 * OP)

    slab = pl.pallas_call(
        kernel,
        out_shape=jax.ShapeDtypeStruct((Bp, 2 * OP), jnp.float32),
        grid_spec=grid_spec,
        compiler_params=pltpu.CompilerParams(
            dimension_semantics=("parallel",)),
        cost_estimate=pl.CostEstimate(
            flops=flops,
            transcendentals=transcendentals,
            bytes_accessed=bytes_accessed),
    )(inv_temp, xp, packed["w0"], packed["w1"], packed["w2p"], packed["sp"])

    logits = slab[:B, :OUT]
    probs = slab[:B, OP:OP + OUT]
    entropy = slab[:B, OUT]            # broadcast into the pad lanes of half 1
    return logits, probs, entropy


def init_params(key, input_dim, hidden_dim, output_dim):
    """Deterministic synthetic parameters (nn.Linear/LayerNorm shapes, weights
    stored transposed as (in, out) for the x @ W convention)."""
    ks = jax.random.split(key, 3)

    def linear(k, d_in, d_out):
        bound = 1.0 / (d_in ** 0.5)
        w = jax.random.uniform(k, (d_in, d_out), jnp.float32, -bound, bound)
        b = jnp.zeros((1, d_out), jnp.float32)
        return w, b

    w0, b0 = linear(ks[0], input_dim, hidden_dim)
    w1, b1 = linear(ks[1], hidden_dim, hidden_dim)
    w2, b2 = linear(ks[2], hidden_dim, output_dim)
    return {
        "w0": w0, "b0": b0,
        "g0": jnp.ones((1, hidden_dim), jnp.float32),
        "be0": jnp.zeros((1, hidden_dim), jnp.float32),
        "w1": w1, "b1": b1,
        "g1": jnp.ones((1, hidden_dim), jnp.float32),
        "be1": jnp.zeros((1, hidden_dim), jnp.float32),
        "w2": w2, "b2": b2,
    }


def _reference(x, p, temperature, ln_eps):
    """Pure-JAX reference mirroring the kernel's mixed precision (bf16 MXU
    inputs, f32 accumulation / LayerNorm / softmax), entropy per the original
    PyTorch formula -sum(p * log(p + 1e-8))."""
    def bf(v):
        return v.astype(jnp.bfloat16)

    def layer(h, w, b, g, be):
        h = jnp.dot(bf(h), bf(w), preferred_element_type=jnp.float32) + b
        m = h.mean(-1, keepdims=True)
        v = ((h - m) ** 2).mean(-1, keepdims=True)
        h = (h - m) * jax.lax.rsqrt(v + ln_eps) * g + be
        return jnp.maximum(h, 0.0)

    h = layer(x, p["w0"], p["b0"], p["g0"], p["be0"])
    h = layer(h, p["w1"], p["b1"], p["g1"], p["be1"])
    logits = jnp.dot(bf(h), bf(p["w2"]), preferred_element_type=jnp.float32) + p["b2"]
    probs = jax.nn.softmax(logits / temperature, axis=-1)
    entropy = -jnp.sum(probs * jnp.log(probs + 1e-8), axis=-1)
    return logits, probs, entropy


if __name__ == "__main__":
    # PolicyConfig defaults: input=128, hidden=256, out=10.  B=32 keeps shapes
    # small but still gives >= 2 grid steps (megacore-shardable on v7x).
    B, input_dim, hidden_dim, output_dim = 32, 128, 256, 10

    key = jax.random.PRNGKey(0)
    kx, kp = jax.random.split(key)
    x = jax.random.normal(kx, (B, input_dim), jnp.float32)
    params = init_params(kp, input_dim, hidden_dim, output_dim)
    packed = pack_params(params)  # one-time packing, off the hot path

    fwd = jax.jit(lambda xx, pp, t: policy_forward(
        xx, pp, out_dim=output_dim, temperature=t))

    logits, probs, entropy = fwd(x, packed, jnp.asarray(1.0, jnp.float32))
    jax.block_until_ready((logits, probs, entropy))

    # Correctness check against a pure-JAX reference (same mixed precision).
    ref_logits, ref_probs, ref_entropy = _reference(x, params, 1.0, 1e-5)
    assert jnp.allclose(logits, ref_logits, atol=2e-3, rtol=2e-3)
    assert jnp.allclose(probs, ref_probs, atol=1e-3, rtol=1e-3)
    assert jnp.allclose(entropy, ref_entropy, atol=1e-3, rtol=1e-3)

    # Temperature change reuses the same compiled kernel (SMEM scalar).
    _, probs2, entropy2 = fwd(x, packed, jnp.asarray(0.7, jnp.float32))
    _, ref_probs2, ref_entropy2 = _reference(x, params, 0.7, 1e-5)
    assert jnp.allclose(probs2, ref_probs2, atol=1e-3, rtol=1e-3)
    assert jnp.allclose(entropy2, ref_entropy2, atol=1e-3, rtol=1e-3)

    # TODO(synk): sample_action (torch.multinomial) is stochastic host-side
    # sampling; it is left out of the kernel (probs are returned instead).
    print("KERNEL_OK")
</pallas_src>

<mosaic_0001>
module attributes {stable_mosaic.version = 11 : i64} {
  func.func @_policy_kernel(%arg0: i32, %arg1: memref<1xf32, #tpu.memory_space<smem>>, %arg2: memref<16x128xf32, #tpu.memory_space<vmem>>, %arg3: memref<128x256xbf16, #tpu.memory_space<vmem>>, %arg4: memref<256x256xbf16, #tpu.memory_space<vmem>>, %arg5: memref<256x128xbf16, #tpu.memory_space<vmem>>, %arg6: memref<8x256xf32, #tpu.memory_space<vmem>>, %arg7: memref<16x256xf32, #tpu.memory_space<vmem>>) attributes {dimension_semantics = [#tpu.dimension_semantics<parallel>], iteration_bounds = array<i64: 2>, scalar_prefetch = 1 : i64, scratch_operands = 0 : i64, tpu.core_type = #tpu.core_type<tc>, window_params = [{transform_indices = @transform_0, window_bounds = array<i64: 16, 128>}, {pipeline_mode = #tpu.pipeline_mode<synchronous>, transform_indices = @transform_1, window_bounds = array<i64: 128, 256>}, {pipeline_mode = #tpu.pipeline_mode<synchronous>, transform_indices = @transform_2, window_bounds = array<i64: 256, 256>}, {pipeline_mode = #tpu.pipeline_mode<synchronous>, transform_indices = @transform_3, window_bounds = array<i64: 256, 128>}, {pipeline_mode = #tpu.pipeline_mode<synchronous>, transform_indices = @transform_4, window_bounds = array<i64: 8, 256>}, {transform_indices = @transform_5, window_bounds = array<i64: 16, 256>}]} {
    %c0 = arith.constant 0 : index
    %0 = memref.load %arg1[%c0] : memref<1xf32, #tpu.memory_space<smem>>
    %c0_0 = arith.constant 0 : index
    %c0_1 = arith.constant 0 : index
    %1 = vector.load %arg2[%c0_0, %c0_1] : memref<16x128xf32, #tpu.memory_space<vmem>>, vector<16x128xf32>
    %c0_2 = arith.constant 0 : index
    %c0_3 = arith.constant 0 : index
    %2 = vector.load %arg6[%c0_2, %c0_3] : memref<8x256xf32, #tpu.memory_space<vmem>>, vector<8x256xf32>
    %3 = vector.extract_strided_slice %2 {offsets = [0, 0], sizes = [1, 256], strides = [1, 1]} : vector<8x256xf32> to vector<1x256xf32>
    %4 = vector.extract_strided_slice %2 {offsets = [1, 0], sizes = [1, 256], strides = [1, 1]} : vector<8x256xf32> to vector<1x256xf32>
    %5 = vector.extract_strided_slice %2 {offsets = [2, 0], sizes = [1, 256], strides = [1, 1]} : vector<8x256xf32> to vector<1x256xf32>
    %6 = vector.extract_strided_slice %2 {offsets = [3, 0], sizes = [1, 256], strides = [1, 1]} : vector<8x256xf32> to vector<1x256xf32>
    %7 = vector.extract_strided_slice %2 {offsets = [4, 0], sizes = [1, 256], strides = [1, 1]} : vector<8x256xf32> to vector<1x256xf32>
    %8 = vector.extract_strided_slice %2 {offsets = [5, 0], sizes = [1, 256], strides = [1, 1]} : vector<8x256xf32> to vector<1x256xf32>
    %9 = vector.extract_strided_slice %2 {offsets = [6, 0], sizes = [1, 128], strides = [1, 1]} : vector<8x256xf32> to vector<1x128xf32>
    %10 = arith.truncf %1 : vector<16x128xf32> to vector<16x128xbf16>
    %c0_4 = arith.constant 0 : index
    %c0_5 = arith.constant 0 : index
    %11 = vector.load %arg3[%c0_4, %c0_5] : memref<128x256xbf16, #tpu.memory_space<vmem>>, vector<128x256xbf16>
    %cst = arith.constant dense<0.000000e+00> : vector<16x256xf32>
    %12 = tpu.matmul %10, %11, %cst {dimension_numbers = #tpu.dot_dimension_numbers<[1], [0], [0], [1], [0, 0, 1, 1], [], []>} : vector<16x128xbf16>, vector<128x256xbf16>, vector<16x256xf32> -> vector<16x256xf32>
    %13 = vector.broadcast %3 : vector<1x256xf32> to vector<16x256xf32>
    %14 = arith.addf %12, %13 : vector<16x256xf32>
    %cst_6 = arith.constant dense<0.000000e+00> : vector<16xf32>
    %15 = vector.multi_reduction <add>, %14, %cst_6 [1] : vector<16x256xf32> to vector<16xf32>
    %16 = vector.shape_cast %15 : vector<16xf32> to vector<16x1xf32>
    %cst_7 = arith.constant 2.560000e+02 : f32
    %17 = vector.broadcast %cst_7 : f32 to vector<16x1xf32>
    %18 = arith.divf %16, %17 : vector<16x1xf32>
    %19 = vector.broadcast %18 : vector<16x1xf32> to vector<16x256xf32>
    %20 = arith.subf %14, %19 : vector<16x256xf32>
    %21 = arith.mulf %20, %20 : vector<16x256xf32>
    %cst_8 = arith.constant dense<0.000000e+00> : vector<16xf32>
    %22 = vector.multi_reduction <add>, %21, %cst_8 [1] : vector<16x256xf32> to vector<16xf32>
    %23 = vector.shape_cast %22 : vector<16xf32> to vector<16x1xf32>
    %cst_9 = arith.constant 2.560000e+02 : f32
    %24 = vector.broadcast %cst_9 : f32 to vector<16x1xf32>
    %25 = arith.divf %23, %24 : vector<16x1xf32>
    %cst_10 = arith.constant 9.99999974E-6 : f32
    %26 = vector.broadcast %cst_10 : f32 to vector<16x1xf32>
    %27 = arith.addf %25, %26 : vector<16x1xf32>
    %28 = math.rsqrt %27 : vector<16x1xf32>
    %29 = vector.broadcast %28 : vector<16x1xf32> to vector<16x256xf32>
    %30 = arith.mulf %20, %29 : vector<16x256xf32>
    %31 = vector.broadcast %4 : vector<1x256xf32> to vector<16x256xf32>
    %32 = arith.mulf %30, %31 : vector<16x256xf32>
    %33 = vector.broadcast %5 : vector<1x256xf32> to vector<16x256xf32>
    %34 = arith.addf %32, %33 : vector<16x256xf32>
    %cst_11 = arith.constant 0.000000e+00 : f32
    %35 = vector.broadcast %cst_11 : f32 to vector<16x256xf32>
    %36 = arith.maximumf %34, %35 : vector<16x256xf32>
    %37 = arith.truncf %36 : vector<16x256xf32> to vector<16x256xbf16>
    %c0_12 = arith.constant 0 : index
    %c0_13 = arith.constant 0 : index
    %38 = vector.load %arg4[%c0_12, %c0_13] : memref<256x256xbf16, #tpu.memory_space<vmem>>, vector<256x256xbf16>
    %cst_14 = arith.constant dense<0.000000e+00> : vector<16x256xf32>
    %39 = tpu.matmul %37, %38, %cst_14 {dimension_numbers = #tpu.dot_dimension_numbers<[1], [0], [0], [1], [0, 0, 1, 1], [], []>} : vector<16x256xbf16>, vector<256x256xbf16>, vector<16x256xf32> -> vector<16x256xf32>
    %40 = vector.broadcast %6 : vector<1x256xf32> to vector<16x256xf32>
    %41 = arith.addf %39, %40 : vector<16x256xf32>
    %cst_15 = arith.constant dense<0.000000e+00> : vector<16xf32>
    %42 = vector.multi_reduction <add>, %41, %cst_15 [1] : vector<16x256xf32> to vector<16xf32>
    %43 = vector.shape_cast %42 : vector<16xf32> to vector<16x1xf32>
    %cst_16 = arith.constant 2.560000e+02 : f32
    %44 = vector.broadcast %cst_16 : f32 to vector<16x1xf32>
    %45 = arith.divf %43, %44 : vector<16x1xf32>
    %46 = vector.broadcast %45 : vector<16x1xf32> to vector<16x256xf32>
    %47 = arith.subf %41, %46 : vector<16x256xf32>
    %48 = arith.mulf %47, %47 : vector<16x256xf32>
    %cst_17 = arith.constant dense<0.000000e+00> : vector<16xf32>
    %49 = vector.multi_reduction <add>, %48, %cst_17 [1] : vector<16x256xf32> to vector<16xf32>
    %50 = vector.shape_cast %49 : vector<16xf32> to vector<16x1xf32>
    %cst_18 = arith.constant 2.560000e+02 : f32
    %51 = vector.broadcast %cst_18 : f32 to vector<16x1xf32>
    %52 = arith.divf %50, %51 : vector<16x1xf32>
    %cst_19 = arith.constant 9.99999974E-6 : f32
    %53 = vector.broadcast %cst_19 : f32 to vector<16x1xf32>
    %54 = arith.addf %52, %53 : vector<16x1xf32>
    %55 = math.rsqrt %54 : vector<16x1xf32>
    %56 = vector.broadcast %55 : vector<16x1xf32> to vector<16x256xf32>
    %57 = arith.mulf %47, %56 : vector<16x256xf32>
    %58 = vector.broadcast %7 : vector<1x256xf32> to vector<16x256xf32>
    %59 = arith.mulf %57, %58 : vector<16x256xf32>
    %60 = vector.broadcast %8 : vector<1x256xf32> to vector<16x256xf32>
    %61 = arith.addf %59, %60 : vector<16x256xf32>
    %cst_20 = arith.constant 0.000000e+00 : f32
    %62 = vector.broadcast %cst_20 : f32 to vector<16x256xf32>
    %63 = arith.maximumf %61, %62 : vector<16x256xf32>
    %64 = arith.truncf %63 : vector<16x256xf32> to vector<16x256xbf16>
    %c0_21 = arith.constant 0 : index
    %c0_22 = arith.constant 0 : index
    %65 = vector.load %arg5[%c0_21, %c0_22] : memref<256x128xbf16, #tpu.memory_space<vmem>>, vector<256x128xbf16>
    %cst_23 = arith.constant dense<0.000000e+00> : vector<16x128xf32>
    %66 = tpu.matmul %64, %65, %cst_23 {dimension_numbers = #tpu.dot_dimension_numbers<[1], [0], [0], [1], [0, 0, 1, 1], [], []>} : vector<16x256xbf16>, vector<256x128xbf16>, vector<16x128xf32> -> vector<16x128xf32>
    %67 = vector.broadcast %9 : vector<1x128xf32> to vector<16x128xf32>
    %68 = arith.addf %66, %67 : vector<16x128xf32>
    %69 = vector.broadcast %0 : f32 to vector<16x128xf32>
    %70 = arith.mulf %68, %69 : vector<16x128xf32>
    %cst_24 = arith.constant -1.000000e+30 : f32
    %71 = vector.broadcast %cst_24 : f32 to vector<16x128xf32>
    %72 = arith.maximumf %70, %71 : vector<16x128xf32>
    %cst_25 = arith.constant dense<0xFF800000> : vector<16xf32>
    %73 = vector.multi_reduction <maximumf>, %72, %cst_25 [1] : vector<16x128xf32> to vector<16xf32>
    %74 = vector.shape_cast %73 : vector<16xf32> to vector<16x1xf32>
    %75 = vector.broadcast %74 : vector<16x1xf32> to vector<16x128xf32>
    %76 = arith.subf %72, %75 : vector<16x128xf32>
    %77 = math.exp %76 : vector<16x128xf32>
    %cst_26 = arith.constant dense<0.000000e+00> : vector<16xf32>
    %78 = vector.multi_reduction <add>, %77, %cst_26 [1] : vector<16x128xf32> to vector<16xf32>
    %79 = vector.shape_cast %78 : vector<16xf32> to vector<16x1xf32>
    %80 = tpu.reciprocal %79 : vector<16x1xf32> -> vector<16x1xf32>
    %81 = vector.broadcast %80 : vector<16x1xf32> to vector<16x128xf32>
    %82 = arith.mulf %77, %81 : vector<16x128xf32>
    %83 = math.log %79 : vector<16x1xf32>
    %84 = arith.mulf %82, %76 : vector<16x128xf32>
    %cst_27 = arith.constant dense<0.000000e+00> : vector<16xf32>
    %85 = vector.multi_reduction <add>, %84, %cst_27 [1] : vector<16x128xf32> to vector<16xf32>
    %86 = vector.shape_cast %85 : vector<16xf32> to vector<16x1xf32>
    %87 = arith.subf %83, %86 : vector<16x1xf32>
    %88 = tpu.iota {dimensions = array<i32: 1>} : vector<16x128xi32>
    %c10_i32 = arith.constant 10 : i32
    %89 = vector.broadcast %c10_i32 : i32 to vector<16x128xi32>
    %90 = arith.cmpi slt, %88, %89 : vector<16x128xi32>
    %91 = vector.shape_cast %87 : vector<16x1xf32> to vector<16x1xf32>
    %92 = vector.broadcast %91 : vector<16x1xf32> to vector<16x128xf32>
    %93 = arith.select %90, %68, %92 : vector<16x128xi1>, vector<16x128xf32>
    %c0_28 = arith.constant 0 : index
    %c0_29 = arith.constant 0 : index
    %94 = vector.load %arg7[%c0_28, %c0_29] : memref<16x256xf32, #tpu.memory_space<vmem>>, vector<16x128xf32>
    tpu.vector_store %arg7[%c0_28, %c0_29], %93 {strides = array<i32>} : memref<16x256xf32, #tpu.memory_space<vmem>>, vector<16x128xf32>,
    %c0_30 = arith.constant 0 : index
    %c128 = arith.constant 128 : index
    %95 = vector.load %arg7[%c0_30, %c128] : memref<16x256xf32, #tpu.memory_space<vmem>>, vector<16x128xf32>
    tpu.vector_store %arg7[%c0_30, %c128], %82 {strides = array<i32>} : memref<16x256xf32, #tpu.memory_space<vmem>>, vector<16x128xf32>,
    return
  }
  func.func @transform_0(%arg0: i32, %arg1: memref<1xf32, #tpu.memory_space<smem>>) -> (i32, i32) {
    %c0_i32 = arith.constant 0 : i32
    %c0_i32_0 = arith.constant 0 : i32
    return %arg0, %c0_i32 : i32, i32
  }
  func.func @transform_1(%arg0: i32, %arg1: memref<1xf32, #tpu.memory_space<smem>>) -> (i32, i32) {
    %c0_i32 = arith.constant 0 : i32
    %c0_i32_0 = arith.constant 0 : i32
    %c0_i32_1 = arith.constant 0 : i32
    return %c0_i32, %c0_i32_0 : i32, i32
  }
  func.func @transform_2(%arg0: i32, %arg1: memref<1xf32, #tpu.memory_space<smem>>) -> (i32, i32) {
    %c0_i32 = arith.constant 0 : i32
    %c0_i32_0 = arith.constant 0 : i32
    %c0_i32_1 = arith.constant 0 : i32
    return %c0_i32, %c0_i32_0 : i32, i32
  }
  func.func @transform_3(%arg0: i32, %arg1: memref<1xf32, #tpu.memory_space<smem>>) -> (i32, i32) {
    %c0_i32 = arith.constant 0 : i32
    %c0_i32_0 = arith.constant 0 : i32
    %c0_i32_1 = arith.constant 0 : i32
    return %c0_i32, %c0_i32_0 : i32, i32
  }
  func.func @transform_4(%arg0: i32, %arg1: memref<1xf32, #tpu.memory_space<smem>>) -> (i32, i32) {
    %c0_i32 = arith.constant 0 : i32
    %c0_i32_0 = arith.constant 0 : i32
    %c0_i32_1 = arith.constant 0 : i32
    return %c0_i32, %c0_i32_0 : i32, i32
  }
  func.func @transform_5(%arg0: i32, %arg1: memref<1xf32, #tpu.memory_space<smem>>) -> (i32, i32) {
    %c0_i32 = arith.constant 0 : i32
    %c0_i32_0 = arith.constant 0 : i32
    return %arg0, %c0_i32 : i32, i32
  }
}

</mosaic_0001>

<bundles_post_ra>
// kernel: _lambda_.1
= control target key start
LH: loop header
LB: loop body
LE: loop exit
PB: predicated region body
PF: predicated region fallthrough
CT: control target
= control target key end

     0   :  { %s1959_s0 = inlined_call_operand.<no memory space> [shape: f32[1], index: 0, kind: input, shape index: {}]   ;;  %s1960_s1 = inlined_call_operand.hbm [shape: f32[32,128], index: 1, kind: input, shape index: {}]   ;;  %s1961_s2 = inlined_call_operand.hbm [shape: bf16[128,256], index: 2, kind: input, shape index: {}]   ;;  %s1962_s3 = inlined_call_operand.hbm [shape: bf16[256,256], index: 3, kind: input, shape index: {}]   ;;  %s1963_s4 = inlined_call_operand.hbm [shape: bf16[256,128], index: 4, kind: input, shape index: {}]   ;;  %s1964_s5 = inlined_call_operand.hbm [shape: f32[8,256], index: 5, kind: input, shape index: {}]   ;;  %s1965_s6 = inlined_call_operand.vmem [shape: f32[32,256], index: 6, kind: output, shape index: {}]  }
   0x1   :  { %11 = sst [smem:[#allocation3]] %s1959_s0 }
   0x2   :  { %12 = vsyncpa [#allocation5], 0 }
   0x3   :  { %14 = vsyncpa [#allocation5 + $0x1], 0 }
   0x4   :  { %15 = vsyncpa [#allocation7], 0 }
   0x5   :  { %16 = vsyncpa [#allocation10], 0  ;;  %s1690_s23 = smov 0   ;;  %s1692_s24 = smov 0  }
   0x6   :  { %s1694_s25 = smov 0   ;;  %s1696_s26 = smov 0  }
   0x7 LB: > { %s1153_s0 = sadd.s32 4294967295, %s1640_s26   ;;  %p42_p0 = scmp.ne.s32.totalorder %s1632_s24, %s1628_s23  ;;  %s1640_s26 = sphi %s1696_s26, %s1982_s26   ;;  %s1636_s25 = sphi %s1694_s25, %s1981_s25   ;;  %s1632_s24 = sphi %s1692_s24, %s1980_s24   ;;  %s1628_s23 = sphi %s1690_s23, %s1979_s23  }
   0x8   : > { %p1712_p1 = scmp.eq.s32.totalorder %s1153_s0, 0  ;;  %p1155_p2 = scmp.ge.s32.totalorder %s1640_s26, 1 }
   0x9   : > { %p163_p3 = scmp.lt.s32.totalorder %s1640_s26, 3  ;;  %s1642_s30 = smov [#allocation6]  }
   0xa   : > { %s1970_s27 = scalar_select %p1712_p1, 1, 0 }
   0xb   : > { %p1720_p4 = por %p1712_p1, %p42_p0  ;;  %p1724_p5 = pnand %p1155_p2, %p163_p3 }
   0xc   : > { %s175_s7 = sshll.u32 %s1642_s30, 4  ;;  %s1643_s9 = smov [#allocation9]   ;;  %s176_s7 = int_to_ptr.vmem [resolvable:$true] %s175_s7 }
   0xd   : > { %s1971_s28 = scalar_select %p1720_p4, 1, 0 }
   0xe   : > { %s1972_s29 = scalar_select %p1724_p5, 1, 0 }
   0xf   : > { %p1281_p6 = pneg %p1724_p5  ;;  %s201_s10 = sshll.u32 %s1643_s9, 4  ;;  %s1736_s10 = int_to_ptr.vmem [resolvable:$true] %s201_s10 }
  0x10   : > { %s1456_s13 = scalar_lea.hbm %s1961_s2, 2048 }
  0x11   : > { %p1732_p7 = pnand %p1281_p6, %p1712_p1  ;;  %p1457_p8 = scmp.ne.s32.totalorder %s1961_s2, %s1456_s13 }
  0x12   : > { %p1463_p12 = scmp.lt.u32.totalorder %s1456_s13, %s1961_s2 }
  0x13   : > { %p1746_p9 = pneg %p1732_p7 }
  0x15   : > { %p1459_p10 = pnand %p1746_p9, %p1457_p8 }
  0x17   : > { %p1460_p11 = pneg %p1459_p10 }
  0x19   : > { %p1465_p13 = pnand %p1463_p12, %p1460_p11 }
  0x1b   : > { %1468 = shalt.err (!%p1465_p13)
}
  0x1c   : > { %s1469_s19 = scalar_lea.vmem %s176_s7, 2048  ;;  %p1477_p6 = scmp.lt.s32.totalorder %s176_s7, %s176_s7 }
  0x1d   : > { %p1470_p0 = scmp.ne.s32.totalorder %s176_s7, %s1469_s19  ;;  %p1478_p1 = scmp.lt.s32.totalorder %s1469_s19, %s1469_s19 }
  0x1f   : > { %p1472_p2 = pnand %p1470_p0, %p1746_p9  ;;  %p1479_p4 = por %p1478_p1, %p1477_p6 }
  0x21   : > { %p1473_p3 = pneg %p1472_p2 }
  0x23   : > { %p1480_p5 = pnand %p1479_p4, %p1473_p3 }
  0x25   : > { %1483 = shalt.err (!%p1480_p5)
}
  0x26   : > { %s1644_s20 = smov 128   ;;  %s1645_s21 = smov 8  }
  0x27   : > { %1284 = dma.hbm_to_vmem [thread:$0]  (!%p1732_p7), %s1961_s2, 2048, %s176_s7, [#allocation7], %s1644_s20, %s1644_s20, %s1645_s21  }
  0x28   : > { %s1484_s11 = scalar_lea.hbm %s1963_s4, 2048 }
  0x29   : > { %p1485_p1 = scmp.ne.s32.totalorder %s1963_s4, %s1484_s11  ;;  %p1491_p8 = scmp.lt.u32.totalorder %s1484_s11, %s1963_s4 }
  0x2b   : > { %p1487_p4 = pnand %p1485_p1, %p1746_p9 }
  0x2d   : > { %p1488_p5 = pneg %p1487_p4 }
  0x2f   : > { %p1493_p10 = pnand %p1491_p8, %p1488_p5 }
  0x31   : > { %1496 = shalt.err (!%p1493_p10)
}
  0x32   : > { %s1497_s7 = scalar_lea.vmem %s1736_s10, 2048  ;;  %p1505_p0 = scmp.lt.s32.totalorder %s1736_s10, %s1736_s10 }
  0x33   : > { %p1498_p11 = scmp.ne.s32.totalorder %s1736_s10, %s1497_s7  ;;  %p1506_p2 = scmp.lt.s32.totalorder %s1497_s7, %s1497_s7 }
  0x35   : > { %p1500_p12 = pnand %p1498_p11, %p1746_p9  ;;  %p1507_p3 = por %p1506_p2, %p1505_p0 }
  0x37   : > { %p1501_p13 = pneg %p1500_p12 }
  0x39   : > { %p1508_p6 = pnand %p1507_p3, %p1501_p13 }
  0x3b   : > { %1511 = shalt.err (!%p1508_p6)
}
  0x3c   : > { %s1646_s17 = smov 64   ;;  %s1647_s18 = smov 4  }
  0x3d   : > { %1290 = dma.hbm_to_vmem [thread:$0]  (!%p1732_p7), %s1963_s4, 2048, %s1736_s10, [#allocation10], %s1646_s17, %s1646_s17, %s1647_s18  }
  0x3e   : > { %s1648_s23 = smov [#allocation8]   ;;  %s1649_s9 = smov [#allocation11]  }
  0x3f   : > { %s188_s30 = sshll.u32 %s1648_s23, 4  ;;  %s215_s11 = sshll.u32 %s1649_s9, 4  ;;  %s189_s30 = int_to_ptr.vmem [resolvable:$true] %s188_s30  ;;  %s1788_s11 = int_to_ptr.vmem [resolvable:$true] %s215_s11 }
  0x40   : > { %s1512_s14 = scalar_lea.hbm %s1962_s3, 4096 }
  0x41   : > { %p1513_p1 = scmp.ne.s32.totalorder %s1962_s3, %s1512_s14  ;;  %p1519_p8 = scmp.lt.u32.totalorder %s1512_s14, %s1962_s3 }
  0x43   : > { %p1515_p4 = pnand %p1513_p1, %p1746_p9 }
  0x45   : > { %p1516_p5 = pneg %p1515_p4 }
  0x47   : > { %p1521_p10 = pnand %p1519_p8, %p1516_p5 }
  0x49   : > { %1524 = shalt.err (!%p1521_p10)
}
  0x4a   : > { %s1525_s17 = scalar_lea.vmem %s189_s30, 4096  ;;  %p1533_p0 = scmp.lt.s32.totalorder %s189_s30, %s189_s30 }
  0x4b   : > { %p1526_p11 = scmp.ne.s32.totalorder %s189_s30, %s1525_s17  ;;  %p1534_p2 = scmp.lt.s32.totalorder %s1525_s17, %s1525_s17 }
  0x4d   : > { %p1528_p12 = pnand %p1526_p11, %p1746_p9  ;;  %p1535_p3 = por %p1534_p2, %p1533_p0 }
  0x4f   : > { %p1529_p13 = pneg %p1528_p12 }
  0x51   : > { %p1536_p6 = pnand %p1535_p3, %p1529_p13 }
  0x53   : > { %1539 = shalt.err (!%p1536_p6)
}
  0x54   : > { %1287 = dma.hbm_to_vmem [thread:$0]  (!%p1732_p7), %s1962_s3, 4096, %s189_s30, [#allocation7], %s1644_s20, %s1644_s20, %s1645_s21  }
  0x55   : > { %s1540_s12 = scalar_lea.hbm %s1964_s5, 256 }
  0x56   : > { %p1541_p1 = scmp.ne.s32.totalorder %s1964_s5, %s1540_s12  ;;  %p1547_p8 = scmp.lt.u32.totalorder %s1540_s12, %s1964_s5 }
  0x58   : > { %p1543_p4 = pnand %p1541_p1, %p1746_p9 }
  0x5a   : > { %p1544_p5 = pneg %p1543_p4 }
  0x5c   : > { %p1549_p10 = pnand %p1547_p8, %p1544_p5 }
  0x5e   : > { %1552 = shalt.err (!%p1549_p10)
}
  0x5f   : > { %s1553_s30 = scalar_lea.vmem %s1788_s11, 256  ;;  %p1561_p0 = scmp.lt.s32.totalorder %s1788_s11, %s1788_s11 }
  0x60   : > { %p1554_p11 = scmp.ne.s32.totalorder %s1788_s11, %s1553_s30  ;;  %p1562_p2 = scmp.lt.s32.totalorder %s1553_s30, %s1553_s30 }
  0x62   : > { %p1556_p12 = pnand %p1554_p11, %p1746_p9  ;;  %p1563_p3 = por %p1562_p2, %p1561_p0 }
  0x64   : > { %p1557_p13 = pneg %p1556_p12 }
  0x66   : > { %p1564_p6 = pnand %p1563_p3, %p1557_p13 }
  0x68   : > { %1567 = shalt.err (!%p1564_p6)
}
  0x69   : > { %1293 = dma.hbm_to_vmem [thread:$0]  (!%p1732_p7), %s1964_s5, 256, %s1788_s11, [#allocation10]  }
  0x6a   : > { %s1835_s16 = sadd.s32 1, %s1640_s26   ;;  %s29_s8 = sadd.s32 1, %s1636_s25 }
  0x6b   : > { %s26_s17 = ssub.s32 %s1640_s26, %s1835_s16  ;;  %p36_p1 = scmp.ne.s32.totalorder %s1636_s25, %s1632_s24 }
  0x6c   : > { %p27_p9 = scmp.eq.s32.totalorder %s26_s17, 0  ;;  %p37_p4 = scmp.eq.s32.totalorder %s1640_s26, 0 }
  0x6d   : > { %p1302_p8 = scmp.lt.s32.totalorder %s1640_s26, 2  ;;  %s226_s22 = sand.u32 1, %s1636_s25  }
  0x6e   : > { %s1844_s18 = scalar_select %p27_p9, %s1636_s25, %s29_s8  }
  0x6f   : > { %p38_p5 = por %p37_p4, %p36_p1  ;;  %s1239_s23 = sshll.u32 %s1640_s26, 8 }
  0x70   : > { %s1161_s9 = sshll.u32 %s226_s22, 4  ;;  %s1852_s14 = scalar_lea.hbm %s1960_s1, %s1239_s23 }
  0x71   : > { %s230_s11 = scalar_lea.vmem [#allocation4], %s1161_s9  ;;  %p1854_p7 = pnand %p1302_p8, %p38_p5 }
  0x72   : > { %s237_s15 = sshll.u32 %s230_s11, 4  ;;  %s1860_s30 = scalar_lea.sflag [#allocation5], %s226_s22  ;;  %s1858_s15 = int_to_ptr.vmem [resolvable:$true] %s237_s15 }
  0x73   : > { %s1568_s19 = scalar_lea.hbm %s1852_s14, 256  ;;  %p1570_p11 = pneg %p1854_p7 }
  0x74   : > { %p1569_p10 = scmp.ne.s32.totalorder %s1852_s14, %s1568_s19  ;;  %s1573_s8 = scalar_lea.hbm %s1960_s1, 512 }
  0x75   : > { %p1574_p0 = scmp.lt.u32.totalorder %s1852_s14, %s1960_s1  ;;  %p1575_p2 = scmp.lt.u32.totalorder %s1573_s8, %s1568_s19 }
  0x76   : > { %p1571_p12 = pnand %p1570_p11, %p1569_p10  ;;  %p1577_p6 = scmp.lt.u32.totalorder %s1568_s19, %s1852_s14 }
  0x77   : > { %p1576_p3 = por %p1575_p2, %p1574_p0 }
  0x78   : > { %p1572_p13 = pneg %p1571_p12 }
  0x79   : > { %p1578_p9 = por %p1577_p6, %p1576_p3 }
  0x7b   : > { %p1579_p1 = pnand %p1578_p9, %p1572_p13 }
  0x7d   : > { %1582 = shalt.err (!%p1579_p1)
}
  0x7e   : > { %s1583_s22 = scalar_lea.vmem %s1858_s15, 256  ;;  %s1650_s12 = smov [#allocation4]  }
  0x7f   : > { %p1584_p4 = scmp.ne.s32.totalorder %s1858_s15, %s1583_s22  ;;  %s1588_s13 = sshll.u32 %s1650_s12, 4  ;;  %s1589_s13 = int_to_ptr.vmem [resolvable:$false] %s1588_s13 }
  0x80   : > { %s1590_s11 = scalar_lea.vmem %s1589_s13, 512  ;;  %p1591_p10 = scmp.lt.s32.totalorder %s1858_s15, %s1589_s13 }
  0x81   : > { %p1586_p5 = pnand %p1584_p4, %p1570_p11  ;;  %p1592_p12 = scmp.lt.s32.totalorder %s1590_s11, %s1583_s22 }
  0x83   : > { %p1587_p8 = pneg %p1586_p5  ;;  %p1593_p0 = por %p1592_p12, %p1591_p10 }
  0x85   : > { %p1594_p2 = pnand %p1593_p0, %p1587_p8 }
  0x87   : > { %1597 = shalt.err (!%p1594_p2)
}
  0x88   : > { %1297 = dma.hbm_to_vmem [thread:$0]  (!%p1854_p7), %s1852_s14, 256, %s1858_s15, %s1860_s30, %s1644_s20, %s1644_s20, %s1645_s21  }
  0x89   : > { %p1976_p11 = scmp.ne.s32.totalorder %s1972_s29, 0 }
  0x8a   : > { %s251_s19 = sand.u32 (!%p1976_p11), 1, %s1632_s24   ;;  %p1977_p13 = scmp.ne.s32.totalorder (!%p1976_p11), %s1971_s28, 0 }
  0x8b   : > { %249 = sbr.rel (%p1976_p11) target bundleno = 1944 (0x798), region = 40  ;;  %s1894_s10 = sshll.u32 (!%p1976_p11), %s251_s19, 4 }
  0x8c   : > { %s252_s17 = scalar_lea.sflag (!%p1976_p11), [#allocation5], %s251_s19  ;;  %s255_s8 = scalar_lea.vmem (!%p1976_p11), [#allocation4], %s1894_s10 }
  0x92   : > { %1615 = dma.done.wait (%p1977_p13), %s252_s17, 256  }
  0x93   : > { %1617 = vsyncadd (%p1977_p13), %s252_s17, 4294967040  ;;  %p1978_p3 = scmp.ne.s32.totalorder %s1970_s27, 0 }
  0x95   : > { %1619 = dma.done.wait (%p1978_p3), [#allocation7], 6144  }
  0x96   : > { %1621 = vsyncadd (%p1978_p3), [#allocation7], 4294961152 }
  0x97   : > { %1623 = dma.done.wait (%p1978_p3), [#allocation10], 2304  }
  0x98   : > { %1625 = vsyncadd (%p1978_p3), [#allocation10], 4294964992  ;;  %v1651_v0 = vmov 0   ;;  %v1348_v1 = vld [vmem:[#allocation6 + $0x4] ss:$8 sps:$4 sm:$0xff]   ;;  %v330_v20 = vlaneseq  ;;  %s308_s27 = sld [smem:[#allocation3]] }
  0x99   : > { %450 = vmatprep.mubr.bf16.mxu0 %v1651_v0  ;;  %v1350_v2 = vld [vmem:[#allocation6] ss:$8 sps:$4 sm:$0xff]   ;;  %418 = vmatprep.subr.bf16.mxu0 %v1348_v1  ;;  %v1351_v3 = vld [vmem:[#allocation6 + $0x14] ss:$8 sps:$4 sm:$0xff]   ;;  %v1353_v4 = vld [vmem:[#allocation6 + $0x10] ss:$8 sps:$4 sm:$0xff]  }
  0x9a   : > { %419 = vmatpush1.bf16.msra.mxu0 %v1350_v2  ;;  %v1354_v5 = vld [vmem:[#allocation6 + $0x24] ss:$8 sps:$4 sm:$0xff]   ;;  %v1356_v6 = vld [vmem:[#allocation6 + $0x20] ss:$8 sps:$4 sm:$0xff]   ;;  %v1357_v7 = vld [vmem:[#allocation6 + $0x34] ss:$8 sps:$4 sm:$0xff]  }
  0x9b   : > { %420 = vmatprep.subr.bf16.mxu0 %v1351_v3  ;;  %v1359_v8 = vld [vmem:[#allocation6 + $0x30] ss:$8 sps:$4 sm:$0xff]   ;;  %v1360_v9 = vld [vmem:[#allocation6 + $0x44] ss:$8 sps:$4 sm:$0xff]   ;;  %v1362_v10 = vld [vmem:[#allocation6 + $0x40] ss:$8 sps:$4 sm:$0xff]  }
  0x9c   : > { %v1363_v11 = vld [vmem:[#allocation6 + $0x54] ss:$8 sps:$4 sm:$0xff]   ;;  %v1365_v12 = vld [vmem:[#allocation6 + $0x50] ss:$8 sps:$4 sm:$0xff]   ;;  %v1366_v13 = vld [vmem:[#allocation6 + $0x64] ss:$8 sps:$4 sm:$0xff]  }
  0x9d   : > { %v1368_v14 = vld [vmem:[#allocation6 + $0x60] ss:$8 sps:$4 sm:$0xff]   ;;  %v1369_v15 = vld [vmem:[#allocation6 + $0x74] ss:$8 sps:$4 sm:$0xff]   ;;  %v1371_v16 = vld [vmem:[#allocation6 + $0x70] ss:$8 sps:$4 sm:$0xff]  }
  0x9e   : > { %421 = vmatpush1.bf16.msra.mxu0 %v1353_v4  ;;  %v309_v17 = vld [vmem:[%s255_s8] sm:$0xff]  ;;  %v310_v18 = vld [vmem:[%s255_s8 + $0x8] sm:$0xff]  ;;  %v1914_v21 = vshrl.u32 %v330_v20, 7  ;;  %s1170_s28 = sshll.u32 %s1153_s0, 1 }
  0x9f   : > { %422 = vmatprep.subr.bf16.mxu0 %v1354_v5  ;;  %v313_v19 = vpack.c.bf16 %v310_v18, %v309_v17  ;;  %v1917_v23 = vld [vmem:[#allocation11] sm:$0xff]  ;;  %v1919_v24 = vld [vmem:[#allocation11 + $0x8] sm:$0xff]  ;;  %v1375_v39 = vld [vmem:[#allocation8 + $0x14] ss:$8 sps:$4 sm:$0xff]   ;;  %p301_p7 = scmp.lt.s32.totalorder %s1170_s28, 3 }
  0xa0   : > { %v332_v22 = vsub.s32 0, %v1914_v21  ;;  %v1372_v37 = vld [vmem:[#allocation8 + $0x4] ss:$8 sps:$4 sm:$0xff]   ;;  %v1374_v38 = vld [vmem:[#allocation8] ss:$8 sps:$4 sm:$0xff]  }
  0xa1   : > { %724 = vmatprep.subr.bf16.mxu1 %v1372_v37  ;;  %v1377_v40 = vld [vmem:[#allocation8 + $0x10] ss:$8 sps:$4 sm:$0xff]   ;;  %v1378_v41 = vld [vmem:[#allocation8 + $0x24] ss:$8 sps:$4 sm:$0xff]   ;;  %v1380_v42 = vld [vmem:[#allocation8 + $0x20] ss:$8 sps:$4 sm:$0xff]  }
  0xa2   : > { %423 = vmatpush1.bf16.msra.mxu0 %v1356_v6  ;;  %v333_v25 = vrot.slane %v1917_v23, %v332_v22  ;;  %v337_v26 = vrot.slane %v1919_v24, %v332_v22  ;;  %725 = vmatpush1.bf16.msra.mxu1 %v1374_v38  ;;  %v1381_v43 = vld [vmem:[#allocation8 + $0x34] ss:$8 sps:$4 sm:$0xff]   ;;  %v1383_v44 = vld [vmem:[#allocation8 + $0x30] ss:$8 sps:$4 sm:$0xff]   ;;  %v1384_v45 = vld [vmem:[#allocation8 + $0x44] ss:$8 sps:$4 sm:$0xff]  }
  0xa3   : > { %424 = vmatprep.subr.bf16.mxu0 %v1357_v7  ;;  %726 = vmatprep.subr.bf16.mxu1 %v1375_v39  ;;  %v1386_v46 = vld [vmem:[#allocation8 + $0x40] ss:$8 sps:$4 sm:$0xff]   ;;  %v1387_v47 = vld [vmem:[#allocation8 + $0x54] ss:$8 sps:$4 sm:$0xff]   ;;  %v1389_v48 = vld [vmem:[#allocation8 + $0x50] ss:$8 sps:$4 sm:$0xff]  }
  0xa4   : > { %v1390_v49 = vld [vmem:[#allocation8 + $0x64] ss:$8 sps:$4 sm:$0xff]   ;;  %v1392_v50 = vld [vmem:[#allocation8 + $0x60] ss:$8 sps:$4 sm:$0xff]   ;;  %v1393_v51 = vld [vmem:[#allocation8 + $0x74] ss:$8 sps:$4 sm:$0xff]  }
  0xa5   : > { %v1395_v52 = vld [vmem:[#allocation8 + $0x70] ss:$8 sps:$4 sm:$0xff]   ;;  %v1396_v53 = vld [vmem:[#allocation8 + $0x84] ss:$8 sps:$4 sm:$0xff]   ;;  %v1398_v54 = vld [vmem:[#allocation8 + $0x80] ss:$8 sps:$4 sm:$0xff]  }
  0xa6   : > { %425 = vmatpush1.bf16.msra.mxu0 %v1359_v8  ;;  %727 = vmatpush1.bf16.msra.mxu1 %v1377_v40  ;;  %v1399_v5 = vld [vmem:[#allocation8 + $0x94] ss:$8 sps:$4 sm:$0xff]   ;;  %v1401_v6 = vld [vmem:[#allocation8 + $0x90] ss:$8 sps:$4 sm:$0xff]   ;;  %v1402_v7 = vld [vmem:[#allocation8 + $0xa4] ss:$8 sps:$4 sm:$0xff]  }
  0xa7   : > { %426 = vmatprep.subr.bf16.mxu0 %v1360_v9  ;;  %728 = vmatprep.subr.bf16.mxu1 %v1378_v41  ;;  %v1404_v8 = vld [vmem:[#allocation8 + $0xa0] ss:$8 sps:$4 sm:$0xff]   ;;  %v1405_v9 = vld [vmem:[#allocation8 + $0xb4] ss:$8 sps:$4 sm:$0xff]   ;;  %v1419_v18 = vld [vmem:[#allocation8 + $0xf0] ss:$8 sps:$4 sm:$0xff]  }
  0xa8   : > { %v1417_v17 = vld [vmem:[#allocation8 + $0xf4] ss:$8 sps:$4 sm:$0xff]   ;;  %s1984_s28 = smov (!%p301_p7, %s1170_s28), 3 }
  0xa9   : > { %s1240_s29 = sshll.u32 %s1984_s28, 4 }
  0xaa   : > { %427 = vmatpush1.bf16.msra.mxu0 %v1362_v10  ;;  %729 = vmatpush1.bf16.msra.mxu1 %v1380_v42  ;;  %v1407_v10 = vld [vmem:[#allocation8 + $0xb0] ss:$8 sps:$4 sm:$0xff]   ;;  %s305_s14 = scalar_lea.vmem %s1965_s6, %s1240_s29 }
  0xab   : > { %428 = vmatprep.subr.bf16.mxu0 %v1363_v11  ;;  %730 = vmatprep.subr.bf16.mxu1 %v1381_v43  ;;  %v1408_v11 = vld [vmem:[#allocation8 + $0xc4] ss:$8 sps:$4 sm:$0xff]  }
  0xae   : > { %429 = vmatpush1.bf16.msra.mxu0 %v1365_v12  ;;  %731 = vmatpush1.bf16.msra.mxu1 %v1383_v44  ;;  %v1410_v12 = vld [vmem:[#allocation8 + $0xc0] ss:$8 sps:$4 sm:$0xff]  }
  0xaf   : > { %430 = vmatprep.subr.bf16.mxu0 %v1366_v13  ;;  %732 = vmatprep.subr.bf16.mxu1 %v1384_v45  ;;  %v1411_v13 = vld [vmem:[#allocation8 + $0xd4] ss:$8 sps:$4 sm:$0xff]  }
  0xb2   : > { %431 = vmatpush1.bf16.msra.mxu0 %v1368_v14  ;;  %733 = vmatpush1.bf16.msra.mxu1 %v1386_v46  ;;  %v1413_v14 = vld [vmem:[#allocation8 + $0xd0] ss:$8 sps:$4 sm:$0xff]  }
  0xb3   : > { %432 = vmatprep.subr.bf16.mxu0 %v1369_v15  ;;  %734 = vmatprep.subr.bf16.mxu1 %v1387_v47  ;;  %v1414_v15 = vld [vmem:[#allocation8 + $0xe4] ss:$8 sps:$4 sm:$0xff]  }
  0xb6   : > { %433 = vmatpush1.bf16.msra.mxu0 %v1371_v16  ;;  %735 = vmatpush1.bf16.msra.mxu1 %v1389_v48  ;;  %v1416_v16 = vld [vmem:[#allocation8 + $0xe0] ss:$8 sps:$4 sm:$0xff]  }
  0xb7   : > { %736 = vmatprep.subr.bf16.mxu1 %v1390_v49 }
  0xb9   : > { %451 = vmatmul.mubr.bf16.vlgmr.msra.gmra.mrb[0].mxu0 %v313_v19 }
  0xba   : > { %737 = vmatpush1.bf16.msra.mxu1 %v1392_v50 }
  0xbb   : > { %738 = vmatprep.subr.bf16.mxu1 %v1393_v51 }
  0xbe   : > { %739 = vmatpush1.bf16.msra.mxu1 %v1395_v52 }
  0xbf   : > { %740 = vmatprep.subr.bf16.mxu1 %v1396_v53 }
  0xc2   : > { %741 = vmatpush1.bf16.msra.mxu1 %v1398_v54 }
  0xc3   : > { %742 = vmatprep.subr.bf16.mxu1 %v1399_v5  ;;  %v1421_v5 = vld [vmem:[#allocation9] sm:$0xff]  }
  0xc6   : > { %743 = vmatpush1.bf16.msra.mxu1 %v1401_v6 }
  0xc7   : > { %744 = vmatprep.subr.bf16.mxu1 %v1402_v7 }
  0xca   : > { %745 = vmatpush1.bf16.msra.mxu1 %v1404_v8 }
  0xcb   : > { %746 = vmatprep.subr.bf16.mxu1 %v1405_v9 }
  0xce   : > { %747 = vmatpush1.bf16.msra.mxu1 %v1407_v10 }
  0xcf   : > { %748 = vmatprep.subr.bf16.mxu1 %v1408_v11 }
  0xd2   : > { %749 = vmatpush1.bf16.msra.mxu1 %v1410_v12 }
  0xd3   : > { %750 = vmatprep.subr.bf16.mxu1 %v1411_v13 }
  0xd6   : > { %751 = vmatpush1.bf16.msra.mxu1 %v1413_v14 }
  0xd7   : > { %752 = vmatprep.subr.bf16.mxu1 %v1414_v15 }
  0xda   : > { %753 = vmatpush1.bf16.msra.mxu1 %v1416_v16 }
  0xdb   : > { %754 = vmatprep.subr.bf16.mxu1 %v1417_v17 }
  0xde   : > { %755 = vmatpush1.bf16.msra.mxu1 %v1419_v18 }
 0x18c   : > { %v452_v27 = vpop.f32.mrb[0].mxu0 }
 0x18d   : > { %v453_v28 = vadd.f32 %v452_v27, %v333_v25  ;;  %v454_v29 = vpop.f32.mrb[1].mxu0 }
 0x18e   : > { %v455_v30 = vadd.f32 %v454_v29, %v337_v26  ;;  %v456_v31 = vpop.f32.mrb[2].mxu0  ;;  %v496_v29 = vsub.s32 1, %v1914_v21 }
 0x18f   : > { %v458_v32 = vpop.f32.mrb[3].mxu0  ;;  %v457_v33 = vadd.f32 %v456_v31, %v333_v25  ;;  %v508_v31 = vsub.s32 2, %v1914_v21 }
 0x190   : > { %v459_v34 = vadd.f32 %v458_v32, %v337_v26  ;;  %v461_v35 = vadd.f32 %v455_v30, %v453_v28  ;;  %v497_v32 = vrot.slane %v1917_v23, %v496_v29 }
 0x191   : > { %v513_v37 = vrot.slane %v1919_v24, %v508_v31  ;;  %v509_v39 = vrot.slane %v1917_v23, %v508_v31  ;;  %v1429_v31 = vld [vmem:[#allocation9 + $0x20] sm:$0xff]  }
 0x192   : > { %462 = vadd.xlane.f32.xlu0 %v461_v35  ;;  %v464_v36 = vadd.f32 %v459_v34, %v457_v33 }
 0x196   : > { %465 = vadd.xlane.f32.xlu0 %v464_v36 }
 0x21f   : > { %v463_v55 = vpop.xlane.xlu0 %462 }
 0x220   : > { %v468_v56 = vmul.f32 0.00390625, %v463_v55  ;;  %v558_v55 = vsub.s32 3, %v1914_v21 }
 0x222   : > { %v470_v57 = vsub.f32 %v453_v28, %v468_v56  ;;  %v471_v58 = vsub.f32 %v455_v30, %v468_v56  ;;  %v501_v30 = vrot.slane %v1919_v24, %v496_v29  ;;  %v559_v56 = vrot.slane %v1917_v23, %v558_v55  ;;  %v1427_v29 = vld [vmem:[#allocation9 + $0x18] sm:$0xff]  }
 0x223   : > { %v466_v59 = vpop.xlane.xlu0 %465 }
 0x224   : > { %v469_v60 = vmul.f32 0.00390625, %v466_v59  ;;  %v474_v61 = vmul.f32 %v470_v57, %v470_v57  ;;  %v475_v62 = vmul.f32 %v471_v58, %v471_v58 }
 0x226   : > { %v472_v63 = vsub.f32 %v457_v33, %v469_v60  ;;  %v473_v0 = vsub.f32 %v459_v34, %v469_v60  ;;  %v478_v1 = vadd.f32 %v475_v62, %v474_v61 }
 0x228   : > { %479 = vadd.xlane.f32.xlu1 %v478_v1  ;;  %v476_v2 = vmul.f32 %v472_v63, %v472_v63  ;;  %v477_v3 = vmul.f32 %v473_v0, %v473_v0 }
 0x22a   : > { %v481_v4 = vadd.f32 %v477_v3, %v476_v2 }
 0x22c   : > { %482 = vadd.xlane.f32.xlu1 %v481_v4  ;;  %v1420_v4 = vld [vmem:[#allocation9 + $0x40] sm:$0xff]  }
 0x22d   : > { %1241 = vmatprep.subr.bf16.mxu0 %v1420_v4 }
 0x22e   : > { %1242 = vmatpush3.bf16.msra.mxu0 %v1421_v5 }
 0x2b5   : > { %v480_v19 = vpop.xlane.xlu1 %479 }
 0x2b6   : > { %v484_v22 = vmul.f32 0.00390625, %v480_v19 }
 0x2b8   : > { %v486_v25 = vadd.f32 1e-05, %v484_v22  ;;  %v1422_v22 = vld [vmem:[#allocation9 + $0x48] sm:$0xff]  }
 0x2b9   : > { %v483_v26 = vpop.xlane.xlu1 %482  ;;  %1243 = vmatprep.subr.bf16.mxu0 %v1422_v22 }
 0x2ba   : > { %1436 = vrsqrt.f32 %v486_v25  ;;  %v485_v27 = vmul.f32 0.00390625, %v483_v26  ;;  %v1423_v25 = vld [vmem:[#allocation9 + $0x8] sm:$0xff]   ;;  %v1424_v26 = vld [vmem:[#allocation9 + $0x50] sm:$0xff]  }
 0x2bb   : > { %1244 = vmatpush3.bf16.msra.mxu0 %v1423_v25 }
 0x2bc   : > { %v487_v28 = vadd.f32 1e-05, %v485_v27  ;;  %v1425_v27 = vld [vmem:[#allocation9 + $0x10] sm:$0xff]   ;;  %1245 = vmatprep.subr.bf16.mxu0 %v1424_v26 }
 0x2be   : > { %1438 = vrsqrt.f32 %v487_v28  ;;  %v1426_v28 = vld [vmem:[#allocation9 + $0x58] sm:$0xff]  }
 0x2bf   : > { %1246 = vmatpush3.bf16.msra.mxu0 %v1425_v27 }
 0x2c0   : > { %1247 = vmatprep.subr.bf16.mxu0 %v1426_v28 }
 0x2c3   : > { %1248 = vmatpush3.bf16.msra.mxu0 %v1427_v29 }
 0x2c4   : > { %v1437_v33 = vpop.eup %1436 }
 0x2c5   : > { %v491_v34 = vmul.f32 %v1437_v33, %v471_v58  ;;  %v490_v35 = vmul.f32 %v1437_v33, %v470_v57  ;;  %v563_v57 = vrot.slane %v1919_v24, %v558_v55  ;;  %v1431_v33 = vld [vmem:[#allocation9 + $0x28] sm:$0xff]  }
 0x2c7   : > { %v503_v36 = vmul.f32 %v501_v30, %v491_v34  ;;  %v502_v38 = vmul.f32 %v497_v32, %v490_v35  ;;  %v1432_v34 = vld [vmem:[#allocation9 + $0x70] sm:$0xff]  }
 0x2c8   : > { %v1439_v40 = vpop.eup %1438  ;;  %v1433_v35 = vld [vmem:[#allocation9 + $0x30] sm:$0xff]  }
 0x2c9   : > { %v493_v41 = vmul.f32 %v1439_v40, %v473_v0  ;;  %v492_v42 = vmul.f32 %v1439_v40, %v472_v63  ;;  %v515_v44 = vadd.f32 %v513_v37, %v503_v36  ;;  %v514_v46 = vadd.f32 %v509_v39, %v502_v38  ;;  %v1434_v36 = vld [vmem:[#allocation9 + $0x78] sm:$0xff]  }
 0x2cb   : > { %v505_v43 = vmul.f32 %v501_v30, %v493_v41  ;;  %v504_v45 = vmul.f32 %v497_v32, %v492_v42  ;;  %v519_v49 = vmax.f32 %v515_v44, 0.0  ;;  %v518_v51 = vmax.f32 %v514_v46, 0.0  ;;  %v1428_v30 = vld [vmem:[#allocation9 + $0x60] sm:$0xff]   ;;  %v1430_v32 = vld [vmem:[#allocation9 + $0x68] sm:$0xff]  }
 0x2cc   : > { %1249 = vmatprep.subr.bf16.mxu0 %v1428_v30  ;;  %v801_v44 = vsub.s32 4, %v1914_v21 }
 0x2cd   : > { %v517_v47 = vadd.f32 %v513_v37, %v505_v43  ;;  %v516_v48 = vadd.f32 %v509_v39, %v504_v45  ;;  %1250 = vmatpush3.bf16.msra.mxu0 %v1429_v31  ;;  %v1435_v37 = vld [vmem:[#allocation9 + $0x38] sm:$0xff]   ;;  %v813_v45 = vsub.s32 5, %v1914_v21 }
 0x2ce   : > { %1251 = vmatprep.subr.bf16.mxu0 %v1430_v32  ;;  %v806_v46 = vrot.slane %v1919_v24, %v801_v44 }
 0x2cf   : > { %v521_v50 = vmax.f32 %v517_v47, 0.0  ;;  %v520_v52 = vmax.f32 %v516_v48, 0.0  ;;  %v802_v47 = vrot.slane %v1917_v23, %v801_v44 }
 0x2d1   : > { %v523_v53 = vpack.c.bf16 %v521_v50, %v519_v49  ;;  %v522_v54 = vpack.c.bf16 %v520_v52, %v518_v51  ;;  %1252 = vmatpush3.bf16.msra.mxu0 %v1431_v33  ;;  %v818_v51 = vrot.slane %v1919_v24, %v813_v45  ;;  %v814_v52 = vrot.slane %v1917_v23, %v813_v45 }
 0x2d2   : > { %1253 = vmatprep.subr.bf16.mxu0 %v1432_v34  ;;  %v863_v24 = vsub.s32 6, %v1914_v21 }
 0x2d3   : > { %756 = vmatprep.mubr.bf16.mxu1 %v523_v53 }
 0x2d4   : > { %757 = vmatmul.mubr.bf16.vlgmr.msra.gmra.mrb[0].mxu1 %v522_v54 }
 0x2d5   : > { %1254 = vmatpush3.bf16.msra.mxu0 %v1433_v35 }
 0x2d6   : > { %1255 = vmatprep.subr.bf16.mxu0 %v1434_v36 }
 0x2d9   : > { %1256 = vmatpush3.bf16.msra.mxu0 %v1435_v37 }
 0x3a7   : > { %v758_v58 = vpop.f32.mrb[0].mxu1 }
 0x3a8   : > { %v759_v59 = vadd.f32 %v758_v58, %v559_v56  ;;  %v760_v60 = vpop.f32.mrb[1].mxu1 }
 0x3a9   : > { %v761_v61 = vadd.f32 %v760_v60, %v563_v57  ;;  %v762_v62 = vpop.f32.mrb[2].mxu1 }
 0x3aa   : > { %v763_v63 = vadd.f32 %v762_v62, %v559_v56  ;;  %v764_v0 = vpop.f32.mrb[3].mxu1 }
 0x3ab   : > { %v765_v1 = vadd.f32 %v764_v0, %v563_v57  ;;  %v767_v2 = vadd.f32 %v761_v61, %v759_v59 }
 0x3ad   : > { %768 = vadd.xlane.f32.xlu0 %v767_v2  ;;  %v770_v3 = vadd.f32 %v765_v1, %v763_v63 }
 0x3af   : > { %771 = vadd.xlane.f32.xlu1 %v770_v3 }
 0x43a   : > { %v769_v6 = vpop.xlane.xlu0 %768 }
 0x43b   : > { %v773_v7 = vmul.f32 0.00390625, %v769_v6 }
 0x43c   : > { %v772_v8 = vpop.xlane.xlu1 %771 }
 0x43d   : > { %v775_v9 = vsub.f32 %v759_v59, %v773_v7  ;;  %v776_v10 = vsub.f32 %v761_v61, %v773_v7  ;;  %v774_v11 = vmul.f32 0.00390625, %v772_v8  ;;  %v864_v7 = vrot.slane %v1917_v23, %v863_v24 }
 0x43f   : > { %v777_v12 = vsub.f32 %v763_v63, %v774_v11  ;;  %v778_v13 = vsub.f32 %v765_v1, %v774_v11  ;;  %v779_v14 = vmul.f32 %v775_v9, %v775_v9  ;;  %v780_v15 = vmul.f32 %v776_v10, %v776_v10 }
 0x441   : > { %v783_v16 = vadd.f32 %v780_v15, %v779_v14  ;;  %v781_v17 = vmul.f32 %v777_v12, %v777_v12  ;;  %v782_v18 = vmul.f32 %v778_v13, %v778_v13 }
 0x443   : > { %784 = vadd.xlane.f32.xlu0 %v783_v16  ;;  %v786_v19 = vadd.f32 %v782_v18, %v781_v17 }
 0x445   : > { %787 = vadd.xlane.f32.xlu1 %v786_v19 }
 0x4d0   : > { %v785_v38 = vpop.xlane.xlu0 %784 }
 0x4d1   : > { %v789_v39 = vmul.f32 0.00390625, %v785_v38 }
 0x4d2   : > { %v788_v40 = vpop.xlane.xlu1 %787 }
 0x4d3   : > { %v791_v41 = vadd.f32 1e-05, %v789_v39  ;;  %v790_v42 = vmul.f32 0.00390625, %v788_v40  ;;  %v1038_v39 = vand.u32 127, %v330_v20 }
 0x4d5   : > { %1440 = vrsqrt.f32 %v791_v41  ;;  %v792_v43 = vadd.f32 1e-05, %v790_v42  ;;  %vm1039_vm0 = vcmp.lt.s32.totalorder %v1038_v39, 10 }
 0x4d7   : > { %1442 = vrsqrt.f32 %v792_v43 }
 0x4df   : > { %v1441_v48 = vpop.eup %1440 }
 0x4e0   : > { %v795_v49 = vmul.f32 %v1441_v48, %v775_v9  ;;  %v796_v50 = vmul.f32 %v1441_v48, %v776_v10 }
 0x4e1   : > { %v1443_v53 = vpop.eup %1442 }
 0x4e2   : > { %v797_v54 = vmul.f32 %v1443_v53, %v777_v12  ;;  %v798_v55 = vmul.f32 %v1443_v53, %v778_v13  ;;  %v808_v56 = vmul.f32 %v806_v46, %v796_v50  ;;  %v807_v57 = vmul.f32 %v802_v47, %v795_v49 }
 0x4e3   : > { %v1002_v12 = vstv %s308_s27 }
 0x4e4   : > { %v810_v58 = vmul.f32 %v806_v46, %v798_v55  ;;  %v820_v59 = vadd.f32 %v818_v51, %v808_v56  ;;  %v809_v60 = vmul.f32 %v802_v47, %v797_v54  ;;  %v819_v61 = vadd.f32 %v814_v52, %v807_v57 }
 0x4e6   : > { %v822_v62 = vadd.f32 %v818_v51, %v810_v58  ;;  %v821_v63 = vadd.f32 %v814_v52, %v809_v60  ;;  %v824_v0 = vmax.f32 %v820_v59, 0.0  ;;  %v823_v2 = vmax.f32 %v819_v61, 0.0 }
 0x4e8   : > { %v826_v1 = vmax.f32 %v822_v62, 0.0  ;;  %v825_v3 = vmax.f32 %v821_v63, 0.0 }
 0x4ea   : > { %v828_v4 = vpack.c.bf16 %v826_v1, %v824_v0  ;;  %v827_v5 = vpack.c.bf16 %v825_v3, %v823_v2 }
 0x4ec   : > { %993 = vmatprep.mubr.bf16.mxu0 %v828_v4 }
 0x4ed   : > { %994 = vmatmul.mubr.bf16.vlgmr.msra.gmra.mrb[4].mxu0 %v827_v5 }
 0x5c0   : > { %v1257_v6 = vpop.f32.mrb[4].mxu0 }
 0x5c1   : > { %v1258_v8 = vpop.f32.mrb[5].mxu0 }
 0x5c2   : > { %v1259_v9 = vadd.f32 %v1258_v8, %v1257_v6  ;;  %v1260_v10 = vpop.f32.mrb[6].mxu0 }
 0x5c3   : > { %v1261_v11 = vpop.f32.mrb[7].mxu0 }
 0x5c4   : > { %v996_v13 = vadd.f32 %v1259_v9, %v864_v7  ;;  %v1262_v14 = vadd.f32 %v1261_v11, %v1260_v10 }
 0x5c6   : > { %v999_v15 = vadd.f32 %v1262_v14, %v864_v7  ;;  %v1003_v16 = vmul.f32 %v1002_v12, %v996_v13 }
 0x5c8   : > { %v1005_v17 = vmax.f32 %v1003_v16, -1e+30  ;;  %v1004_v18 = vmul.f32 %v1002_v12, %v999_v15 }
 0x5ca   : > { %1007 = vmax.xlane.f32.xlu0 %v1005_v17  ;;  %v1006_v19 = vmax.f32 %v1004_v18, -1e+30 }
 0x5cc   : > { %1009 = vmax.xlane.f32.xlu1 %v1006_v19 }
 0x657   : > { %v1008_v22 = vpop.xlane.xlu0 %1007 }
 0x658   : > { %v1011_v21 = vsub.f32 %v1005_v17, %v1008_v22 }
 0x659   : > { %v1010_v25 = vpop.xlane.xlu1 %1009 }
 0x65a   : > { %v1013_v26 = vmul.f32 1.442695, %v1011_v21  ;;  %v1012_v23 = vsub.f32 %v1006_v19, %v1010_v25 }
 0x65c   : > { %1444 = vpow2.f32 %v1013_v26  ;;  %v1015_v27 = vmul.f32 1.442695, %v1012_v23 }
 0x65e   : > { %1446 = vpow2.f32 %v1015_v27 }
 0x666   : > { %v1445_v28 = vpop.eup %1444 }
 0x667   : > { %1017 = vadd.xlane.f32.xlu0 %v1445_v28 }
 0x668   : > { %v1447_v29 = vpop.eup %1446 }
 0x669   : > { %1019 = vadd.xlane.f32.xlu1 %v1447_v29 }
 0x6f4   : > { %v1018_v30 = vpop.xlane.xlu0 %1017 }
 0x6f5   : > { %1448 = vrcp.f32 %v1018_v30 }
 0x6f6   : > { %v1020_v31 = vpop.xlane.xlu1 %1019 }
 0x6f7   : > { %1450 = vrcp.f32 %v1020_v31 }
 0x6f8   : > { %1452 = vlog2.f32 %v1018_v30 }
 0x6f9   : > { %1454 = vlog2.f32 %v1020_v31 }
 0x6ff   : > { %v1449_v32 = vpop.eup %1448 }
 0x700   : > { %v1023_v33 = vmul.f32 %v1449_v32, %v1445_v28 }
 0x701   : > { %v1451_v34 = vpop.eup %1450 }
 0x702   : > { %v1029_v35 = vmul.f32 %v1023_v33, %v1011_v21  ;;  %1044 = vst [vmem:[%s305_s14 + $0x8] sm:$0xff] %v1023_v33  ;;  %v1024_v36 = vmul.f32 %v1451_v34, %v1447_v29  ;;  %v1453_v38 = vpop.eup %1452 }
 0x703   : > { %v1455_v40 = vpop.eup %1454  ;;  %v1026_v41 = vmul.f32 0.6931472, %v1453_v38 }
 0x704   : > { %1031 = vadd.xlane.f32.xlu0 %v1029_v35  ;;  %v1030_v37 = vmul.f32 %v1024_v36, %v1012_v23  ;;  %1045 = vst [vmem:[%s305_s14 + $0x18] sm:$0xff] %v1024_v36  ;;  %v1028_v44 = vmul.f32 0.6931472, %v1455_v40 }
 0x706   : > { %1033 = vadd.xlane.f32.xlu1 %v1030_v37 }
 0x791   : > { %v1032_v42 = vpop.xlane.xlu0 %1031 }
 0x792   : > { %v1035_v43 = vsub.f32 %v1026_v41, %v1032_v42 }
 0x793   : > { %v1034_v45 = vpop.xlane.xlu1 %1033 }
 0x794   : > { %v1040_v46 = vsel %vm1039_vm0, %v996_v13, %v1035_v43  ;;  %v1036_v47 = vsub.f32 %v1028_v44, %v1034_v45 }
 0x795   : > { %1042 = vst [vmem:[%s305_s14] sm:$0xff] %v1040_v46 }
 0x796   : > { %v1041_v48 = vsel %vm1039_vm0, %v999_v15, %v1036_v47 }
 0x797   : > { %1043 = vst [vmem:[%s305_s14 + $0x10] sm:$0xff] %v1041_v48 }
 0x798 PF: > { %p19_p6 = scmp.ge.s32.totalorder %s1835_s16, 4   ;;  %s1979_s23 = smov %s1632_s24 }
 0x799   : > { %s1980_s24 = smov %s1636_s25  ;;  %s1981_s25 = smov %s1844_s18 }
 0x79a   : > { %s1982_s26 = smov %s1835_s16  ;;  %21 = sbr.rel (!%p19_p6) target bundleno = 7 (0x7), region = 96 }
 0x7a1   :  { %1070 = vsyncpa [#allocation5], 1 }
 0x7a2   :  { %1072 = vsyncpa [#allocation5 + $0x1], 1 }
 0x7a3   :  { %1073 = vsyncpa [#allocation7], 1 }
 0x7a4   :  { %1074 = vsyncpa [#allocation10], 1 }

</bundles_post_ra>
